<compile_context>
chip_gen: v5e
topology: v5e:2x2
jax: 0.10.0
libtpu: 0.0.40
codegen_flags: <defaults>
</compile_context>

<pallas_src>
import functools
import math

import jax
import jax.numpy as jnp
from jax import lax
from jax.experimental import pallas as pl
from jax.experimental.pallas import tpu as pltpu

_LANE = 128      # vreg lane width
_SUBLANE = 8     # f32 sublane height


def _round_up(x, m):
    return ((x + m - 1) // m) * m


def _head_kernel(x_ref, w1_ref, b1_ref, gamma_ref, beta_ref, wd_ref, bd_ref,
                 o_ref, *, eps, true_h, matmul_dtype):
    x = x_ref[...]                                            # (TM, Hp) f32

    # ---- Linear 1 (MXU): x @ W1 + b1 -------------------------------------
    h = jnp.dot(x.astype(matmul_dtype), w1_ref[...],
                preferred_element_type=jnp.float32)
    h = h + b1_ref[...]                                       # (1, Hp) broadcast

    # ---- Exact GELU (matches torch F.gelu approximate='none') ------------
    # TODO(synk): optional tanh-approx GELU would move this to the EUP slot,
    # at the cost of exact-erf numerics vs the PyTorch reference.
    h = 0.5 * h * (1.0 + lax.erf(h * (1.0 / math.sqrt(2.0))))

    # ---- LayerNorm over the true hidden dim (biased variance, like torch) -
    # Padded columns of h are exactly zero (zero-padded W1/b1, gelu(0)=0),
    # so sums over the padded tile equal sums over the true H columns.
    inv_h = 1.0 / float(true_h)
    mean = jnp.sum(h, axis=-1, keepdims=True) * inv_h
    centered = h - mean
    if h.shape[-1] != true_h:
        col = lax.broadcasted_iota(jnp.int32, h.shape, dimension=1)
        centered_for_var = jnp.where(col < true_h, centered, 0.0)
    else:
        centered_for_var = centered
    var = jnp.sum(centered_for_var * centered_for_var, axis=-1,
                  keepdims=True) * inv_h
    hn = centered * lax.rsqrt(var + eps)
    hn = hn * gamma_ref[...] + beta_ref[...]                  # padded gamma/beta = 0

    # ---- Decoder linear (MXU): hn @ Wd + bias -----------------------------
    y = jnp.dot(hn.astype(matmul_dtype), wd_ref[...],
                preferred_element_type=jnp.float32)
    o_ref[...] = (y + bd_ref[...]).astype(o_ref.dtype)


def prepare_params(params, *, matmul_dtype=jnp.bfloat16):
    """One-time parameter prep (hoisted out of the per-call path):
    transpose PyTorch (out,in) Linear weights to (in,out), zero-pad the hidden
    dim up to a lane multiple, and cast the weights to the MXU input dtype."""
    H = params["linear_w"].shape[0]
    Hp = max(_round_up(H, _LANE), _LANE)
    pad = Hp - H

    def pad_mat(w):      # (H, H) -> (Hp, Hp)
        return jnp.pad(w, ((0, pad), (0, pad)))

    def pad_vec(v):      # (H,)   -> (1, Hp)
        return jnp.pad(v, (0, pad)).reshape(1, Hp)

    return {
        "w1_t": pad_mat(params["linear_w"].T).astype(matmul_dtype),
        "wd_t": pad_mat(params["decoder_w"].T).astype(matmul_dtype),
        "b1": pad_vec(params["linear_b"]).astype(jnp.float32),
        "gamma": pad_vec(params["ln_gamma"]).astype(jnp.float32),
        "beta": pad_vec(params["ln_beta"]).astype(jnp.float32),
        "bd": pad_vec(params["bias"]).astype(jnp.float32),
        "hidden_size": H,
        "padded_hidden": Hp,
        "matmul_dtype": matmul_dtype,
    }


def img_prediction_head(hidden_states, prepared, *, eps=1e-12, block_m=None):
    """hidden_states: (B, S, H). prepared: output of prepare_params()."""
    B, S, H = hidden_states.shape
    assert H == prepared["hidden_size"]
    Hp = prepared["padded_hidden"]
    matmul_dtype = prepared["matmul_dtype"]

    M = B * S
    x2d = hidden_states.reshape(M, H).astype(jnp.float32)
    if Hp != H:
        x2d = jnp.pad(x2d, ((0, 0), (0, Hp - H)))

    weight_bytes = 2 * Hp * Hp * jnp.dtype(matmul_dtype).itemsize

    # ---- Row-tile size over M, sized against a generation-safe VMEM budget.
    if block_m is None:
        budget = 20 * (1 << 20)           # fits v7x 64 MiB phys / v5e 16 MiB scoped
        # 2 double-buffered f32 tiles (in + out) + 1 f32 intermediate, per row.
        per_row = 5 * Hp * 4
        block_m = max(_SUBLANE, (budget - weight_bytes) // per_row)
        block_m = int(min(block_m, 512))
    block_m = int(min(block_m, _round_up(M, _SUBLANE)))
    block_m = max(_SUBLANE, (block_m // _SUBLANE) * _SUBLANE)

    Mp = _round_up(M, block_m)
    if Mp != M:
        x2d = jnp.pad(x2d, ((0, Mp - M), (0, 0)))

    grid = (Mp // block_m,)

    # Explicit VMEM limit with headroom (never assume v6e's 128 MiB on v7x).
    est = weight_bytes + 4 * block_m * Hp * 4 + 8 * Hp * 4
    vmem_limit = int(min(max(2 * est, 24 * (1 << 20)), 48 * (1 << 20)))

    x_spec = pl.BlockSpec((block_m, Hp), lambda i: (i, 0))
    w_spec = pl.BlockSpec((Hp, Hp), lambda i: (0, 0))       # resident, DMA'd once
    v_spec = pl.BlockSpec((1, Hp), lambda i: (0, 0))        # resident, DMA'd once
    out_spec = pl.BlockSpec((block_m, Hp), lambda i: (i, 0))

    out = pl.pallas_call(
        functools.partial(_head_kernel, eps=eps, true_h=H,
                          matmul_dtype=matmul_dtype),
        out_shape=jax.ShapeDtypeStruct((Mp, Hp), hidden_states.dtype),
        grid=grid,
        in_specs=[x_spec, w_spec, v_spec, v_spec, v_spec, w_spec, v_spec],
        out_specs=out_spec,
        compiler_params=pltpu.CompilerParams(
            dimension_semantics=("parallel",),
            vmem_limit_bytes=vmem_limit),
    )(x2d, prepared["w1_t"], prepared["b1"], prepared["gamma"],
      prepared["beta"], prepared["wd_t"], prepared["bd"])

    return out[:M, :H].reshape(B, S, H)


def _reference(hidden_states, params, *, eps=1e-12):
    """Pure-JAX f32 reference mirroring the PyTorch forward."""
    x = hidden_states
    h = x @ params["linear_w"].T + params["linear_b"]
    h = 0.5 * h * (1.0 + lax.erf(h / math.sqrt(2.0)))
    mean = jnp.mean(h, axis=-1, keepdims=True)
    var = jnp.mean((h - mean) ** 2, axis=-1, keepdims=True)
    h = (h - mean) * lax.rsqrt(var + eps) * params["ln_gamma"] + params["ln_beta"]
    return h @ params["decoder_w"].T + params["bias"]


if __name__ == "__main__":
    # Small config consistent with the module: batch=2, seq=8, hidden=32.
    B, S, H = 2, 8, 32
    eps = 1e-12

    key = jax.random.PRNGKey(0)
    k_x, k_w1, k_b1, k_wd = jax.random.split(key, 4)

    hidden_states = jax.random.normal(k_x, (B, S, H), dtype=jnp.float32)

    bound = 1.0 / math.sqrt(H)  # PyTorch nn.Linear default init range
    params = {
        "linear_w": jax.random.uniform(k_w1, (H, H), jnp.float32, -bound, bound),
        "linear_b": jax.random.uniform(k_b1, (H,), jnp.float32, -bound, bound),
        "ln_gamma": jnp.ones((H,), jnp.float32),
        "ln_beta": jnp.zeros((H,), jnp.float32),
        "decoder_w": jax.random.uniform(k_wd, (H, H), jnp.float32, -bound, bound),
        "bias": jnp.zeros((H,), jnp.float32),  # decoder.bias = nn.Parameter(zeros)
    }

    ref = _reference(hidden_states, params, eps=eps)

    # Exact-semantics path: f32 MXU operands — must match torch/JAX tightly.
    prep_f32 = prepare_params(params, matmul_dtype=jnp.float32)
    out_f32 = jax.block_until_ready(
        img_prediction_head(hidden_states, prep_f32, eps=eps))
    assert out_f32.shape == (B, S, H)
    assert jnp.allclose(out_f32, ref, atol=1e-5, rtol=1e-5), "f32 mismatch vs reference"

    # Fast path: bf16 MXU operands with f32 accumulation (relaxed tolerance).
    prep_bf16 = prepare_params(params, matmul_dtype=jnp.bfloat16)
    out_bf16 = jax.block_until_ready(
        img_prediction_head(hidden_states, prep_bf16, eps=eps))
    assert out_bf16.shape == (B, S, H)
    assert jnp.allclose(out_bf16, ref, atol=2e-2, rtol=2e-2), "bf16 mismatch vs reference"

    print("KERNEL_OK")
</pallas_src>

<mosaic_0001>
module attributes {stable_mosaic.version = 11 : i64} {
  func.func @_head_kernel(%arg0: i32, %arg1: memref<16x128xf32, #tpu.memory_space<vmem>>, %arg2: memref<128x128xf32, #tpu.memory_space<vmem>>, %arg3: memref<1x128xf32, #tpu.memory_space<vmem>>, %arg4: memref<1x128xf32, #tpu.memory_space<vmem>>, %arg5: memref<1x128xf32, #tpu.memory_space<vmem>>, %arg6: memref<128x128xf32, #tpu.memory_space<vmem>>, %arg7: memref<1x128xf32, #tpu.memory_space<vmem>>, %arg8: memref<16x128xf32, #tpu.memory_space<vmem>>) attributes {dimension_semantics = [#tpu.dimension_semantics<parallel>], iteration_bounds = array<i64: 1>, scalar_prefetch = 0 : i64, scratch_operands = 0 : i64, tpu.core_type = #tpu.core_type<tc>, window_params = [{transform_indices = @transform_0, window_bounds = array<i64: 16, 128>}, {pipeline_mode = #tpu.pipeline_mode<synchronous>, transform_indices = @transform_1, window_bounds = array<i64: 128, 128>}, {pipeline_mode = #tpu.pipeline_mode<synchronous>, transform_indices = @transform_2, window_bounds = array<i64: 1, 128>}, {pipeline_mode = #tpu.pipeline_mode<synchronous>, transform_indices = @transform_3, window_bounds = array<i64: 1, 128>}, {pipeline_mode = #tpu.pipeline_mode<synchronous>, transform_indices = @transform_4, window_bounds = array<i64: 1, 128>}, {pipeline_mode = #tpu.pipeline_mode<synchronous>, transform_indices = @transform_5, window_bounds = array<i64: 128, 128>}, {pipeline_mode = #tpu.pipeline_mode<synchronous>, transform_indices = @transform_6, window_bounds = array<i64: 1, 128>}, {transform_indices = @transform_7, window_bounds = array<i64: 16, 128>}]} {
    %c0 = arith.constant 0 : index
    %c0_0 = arith.constant 0 : index
    %0 = vector.load %arg1[%c0, %c0_0] : memref<16x128xf32, #tpu.memory_space<vmem>>, vector<16x128xf32>
    %c0_1 = arith.constant 0 : index
    %c0_2 = arith.constant 0 : index
    %1 = vector.load %arg2[%c0_1, %c0_2] : memref<128x128xf32, #tpu.memory_space<vmem>>, vector<128x128xf32>
    %cst = arith.constant dense<0.000000e+00> : vector<16x128xf32>
    %2 = tpu.matmul %0, %1, %cst {dimension_numbers = #tpu.dot_dimension_numbers<[1], [0], [0], [1], [0, 0, 1, 1], [], []>} : vector<16x128xf32>, vector<128x128xf32>, vector<16x128xf32> -> vector<16x128xf32>
    %c0_3 = arith.constant 0 : index
    %c0_4 = arith.constant 0 : index
    %3 = vector.load %arg3[%c0_3, %c0_4] : memref<1x128xf32, #tpu.memory_space<vmem>>, vector<1x128xf32>
    %4 = vector.broadcast %3 : vector<1x128xf32> to vector<16x128xf32>
    %5 = arith.addf %2, %4 : vector<16x128xf32>
    %cst_5 = arith.constant 5.000000e-01 : f32
    %6 = vector.broadcast %cst_5 : f32 to vector<16x128xf32>
    %7 = arith.mulf %6, %5 : vector<16x128xf32>
    %cst_6 = arith.constant 0.707106769 : f32
    %8 = vector.broadcast %cst_6 : f32 to vector<16x128xf32>
    %9 = arith.mulf %5, %8 : vector<16x128xf32>
    %10 = math.erf %9 : vector<16x128xf32>
    %cst_7 = arith.constant 1.000000e+00 : f32
    %11 = vector.broadcast %cst_7 : f32 to vector<16x128xf32>
    %12 = arith.addf %11, %10 : vector<16x128xf32>
    %13 = arith.mulf %7, %12 : vector<16x128xf32>
    %cst_8 = arith.constant dense<0.000000e+00> : vector<16xf32>
    %14 = vector.multi_reduction <add>, %13, %cst_8 [1] : vector<16x128xf32> to vector<16xf32>
    %15 = vector.shape_cast %14 : vector<16xf32> to vector<16x1xf32>
    %cst_9 = arith.constant 3.125000e-02 : f32
    %16 = vector.broadcast %cst_9 : f32 to vector<16x1xf32>
    %17 = arith.mulf %15, %16 : vector<16x1xf32>
    %18 = vector.broadcast %17 : vector<16x1xf32> to vector<16x128xf32>
    %19 = arith.subf %13, %18 : vector<16x128xf32>
    %20 = tpu.iota {dimensions = array<i32: 1>} : vector<16x128xi32>
    %c32_i32 = arith.constant 32 : i32
    %21 = vector.broadcast %c32_i32 : i32 to vector<16x128xi32>
    %22 = arith.cmpi slt, %20, %21 : vector<16x128xi32>
    %cst_10 = arith.constant 0.000000e+00 : f32
    %23 = vector.broadcast %cst_10 : f32 to vector<16x128xf32>
    %24 = arith.select %22, %19, %23 : vector<16x128xi1>, vector<16x128xf32>
    %25 = arith.mulf %24, %24 : vector<16x128xf32>
    %cst_11 = arith.constant dense<0.000000e+00> : vector<16xf32>
    %26 = vector.multi_reduction <add>, %25, %cst_11 [1] : vector<16x128xf32> to vector<16xf32>
    %27 = vector.shape_cast %26 : vector<16xf32> to vector<16x1xf32>
    %cst_12 = arith.constant 3.125000e-02 : f32
    %28 = vector.broadcast %cst_12 : f32 to vector<16x1xf32>
    %29 = arith.mulf %27, %28 : vector<16x1xf32>
    %cst_13 = arith.constant 9.99999996E-13 : f32
    %30 = vector.broadcast %cst_13 : f32 to vector<16x1xf32>
    %31 = arith.addf %29, %30 : vector<16x1xf32>
    %32 = math.rsqrt %31 : vector<16x1xf32>
    %33 = vector.broadcast %32 : vector<16x1xf32> to vector<16x128xf32>
    %34 = arith.mulf %19, %33 : vector<16x128xf32>
    %c0_14 = arith.constant 0 : index
    %c0_15 = arith.constant 0 : index
    %35 = vector.load %arg4[%c0_14, %c0_15] : memref<1x128xf32, #tpu.memory_space<vmem>>, vector<1x128xf32>
    %36 = vector.broadcast %35 : vector<1x128xf32> to vector<16x128xf32>
    %37 = arith.mulf %34, %36 : vector<16x128xf32>
    %c0_16 = arith.constant 0 : index
    %c0_17 = arith.constant 0 : index
    %38 = vector.load %arg5[%c0_16, %c0_17] : memref<1x128xf32, #tpu.memory_space<vmem>>, vector<1x128xf32>
    %39 = vector.broadcast %38 : vector<1x128xf32> to vector<16x128xf32>
    %40 = arith.addf %37, %39 : vector<16x128xf32>
    %c0_18 = arith.constant 0 : index
    %c0_19 = arith.constant 0 : index
    %41 = vector.load %arg6[%c0_18, %c0_19] : memref<128x128xf32, #tpu.memory_space<vmem>>, vector<128x128xf32>
    %cst_20 = arith.constant dense<0.000000e+00> : vector<16x128xf32>
    %42 = tpu.matmul %40, %41, %cst_20 {dimension_numbers = #tpu.dot_dimension_numbers<[1], [0], [0], [1], [0, 0, 1, 1], [], []>} : vector<16x128xf32>, vector<128x128xf32>, vector<16x128xf32> -> vector<16x128xf32>
    %c0_21 = arith.constant 0 : index
    %c0_22 = arith.constant 0 : index
    %43 = vector.load %arg7[%c0_21, %c0_22] : memref<1x128xf32, #tpu.memory_space<vmem>>, vector<1x128xf32>
    %44 = vector.broadcast %43 : vector<1x128xf32> to vector<16x128xf32>
    %45 = arith.addf %42, %44 : vector<16x128xf32>
    %c0_23 = arith.constant 0 : index
    %c0_24 = arith.constant 0 : index
    %46 = vector.load %arg8[%c0_23, %c0_24] : memref<16x128xf32, #tpu.memory_space<vmem>>, vector<16x128xf32>
    tpu.vector_store %arg8[%c0_23, %c0_24], %45 {strides = array<i32>} : memref<16x128xf32, #tpu.memory_space<vmem>>, vector<16x128xf32>,
    return
  }
  func.func @transform_0(%arg0: i32) -> (i32, i32) {
    %c0_i32 = arith.constant 0 : i32
    %c0_i32_0 = arith.constant 0 : i32
    return %arg0, %c0_i32 : i32, i32
  }
  func.func @transform_1(%arg0: i32) -> (i32, i32) {
    %c0_i32 = arith.constant 0 : i32
    %c0_i32_0 = arith.constant 0 : i32
    %c0_i32_1 = arith.constant 0 : i32
    return %c0_i32, %c0_i32_0 : i32, i32
  }
  func.func @transform_2(%arg0: i32) -> (i32, i32) {
    %c0_i32 = arith.constant 0 : i32
    %c0_i32_0 = arith.constant 0 : i32
    %c0_i32_1 = arith.constant 0 : i32
    return %c0_i32, %c0_i32_0 : i32, i32
  }
  func.func @transform_3(%arg0: i32) -> (i32, i32) {
    %c0_i32 = arith.constant 0 : i32
    %c0_i32_0 = arith.constant 0 : i32
    %c0_i32_1 = arith.constant 0 : i32
    return %c0_i32, %c0_i32_0 : i32, i32
  }
  func.func @transform_4(%arg0: i32) -> (i32, i32) {
    %c0_i32 = arith.constant 0 : i32
    %c0_i32_0 = arith.constant 0 : i32
    %c0_i32_1 = arith.constant 0 : i32
    return %c0_i32, %c0_i32_0 : i32, i32
  }
  func.func @transform_5(%arg0: i32) -> (i32, i32) {
    %c0_i32 = arith.constant 0 : i32
    %c0_i32_0 = arith.constant 0 : i32
    %c0_i32_1 = arith.constant 0 : i32
    return %c0_i32, %c0_i32_0 : i32, i32
  }
  func.func @transform_6(%arg0: i32) -> (i32, i32) {
    %c0_i32 = arith.constant 0 : i32
    %c0_i32_0 = arith.constant 0 : i32
    %c0_i32_1 = arith.constant 0 : i32
    return %c0_i32, %c0_i32_0 : i32, i32
  }
  func.func @transform_7(%arg0: i32) -> (i32, i32) {
    %c0_i32 = arith.constant 0 : i32
    %c0_i32_0 = arith.constant 0 : i32
    return %arg0, %c0_i32 : i32, i32
  }
}

</mosaic_0001>

<bundles_post_ra>
// kernel: tpu_custom_call.1
= control target key start
LH: loop header
LB: loop body
LE: loop exit
PB: predicated region body
PF: predicated region fallthrough
CT: control target
= control target key end

     0   :  { %12 = vsyncpa [#allocation3], 0  ;;  %s591_s0 = inlined_call_operand.hbm [shape: f32[16,128], index: 0, kind: input, shape index: {}]   ;;  %s592_s1 = inlined_call_operand.hbm [shape: f32[128,128], index: 1, kind: input, shape index: {}]   ;;  %s593_s2 = inlined_call_operand.vmem [shape: f32[1,128], index: 2, kind: input, shape index: {}]   ;;  %s594_s3 = inlined_call_operand.vmem [shape: f32[1,128], index: 3, kind: input, shape index: {}]   ;;  %s595_s4 = inlined_call_operand.vmem [shape: f32[1,128], index: 4, kind: input, shape index: {}]   ;;  %s596_s5 = inlined_call_operand.hbm [shape: f32[128,128], index: 5, kind: input, shape index: {}]   ;;  %s597_s6 = inlined_call_operand.vmem [shape: f32[1,128], index: 6, kind: input, shape index: {}]   ;;  %s598_s7 = inlined_call_operand.hbm [shape: f32[16,128], index: 7, kind: output, shape index: {}]  }
   0x1   :  { %13 = vsyncpa [#allocation6], 0 }
   0x2   :  { %14 = vsyncpa [#allocation4], 0  ;;  %s32_s26 = sshll.u32 %s592_s1, 4  ;;  %s483_s27 = smov [#allocation5]   ;;  %s33_s26 = int_to_ptr.hbm [resolvable:$true] %s32_s26 }
   0x3   :  { %s34_s28 = sshll.u32 %s483_s27, 4  ;;  %s19_s8 = sshll.u32 %s591_s0, 4  ;;  %s35_s28 = int_to_ptr.vmem [resolvable:$true] %s34_s28  ;;  %s20_s8 = int_to_ptr.hbm [resolvable:$true] %s19_s8 }
   0x4   :  { %s484_s9 = smov 128   ;;  %s485_s10 = smov 8  }
   0x5   :  { %40 = dma.hbm_to_vmem [thread:$0]  %s33_s26, 2048, %s35_s28, [#allocation6], %s484_s9, %s484_s9, %s485_s10  }
   0x6   :  { %s486_s11 = smov [#allocation2]   ;;  %s51_s1 = sshll.u32 %s596_s5, 4  ;;  %s52_s1 = int_to_ptr.hbm [resolvable:$true] %s51_s1 }
   0x7   :  { %s21_s12 = sshll.u32 %s486_s11, 4  ;;  %s487_s0 = smov [#allocation7]   ;;  %s22_s12 = int_to_ptr.vmem [resolvable:$true] %s21_s12 }
   0x8   :  { %27 = dma.hbm_to_vmem [thread:$0]  %s20_s8, 256, %s22_s12, [#allocation3], %s484_s9, %s484_s9, %s485_s10  }
   0x9   :  { %s53_s15 = sshll.u32 %s487_s0, 4  ;;  %s54_s15 = int_to_ptr.vmem [resolvable:$true] %s53_s15 }
   0xa   :  { %59 = dma.hbm_to_vmem [thread:$0]  %s52_s1, 2048, %s54_s15, [#allocation6], %s484_s9, %s484_s9, %s485_s10  }
   0xb   :  { %477 = dma.done.wait [#allocation3], 256  }
   0xc   :  { %478 = vsyncadd [#allocation3], 4294967040 }
   0xd   :  { %479 = dma.done.wait [#allocation6], 4096  }
   0xe   :  { %480 = vsyncadd [#allocation6], 4294963200  ;;  %v91_v0 = vld [vmem:[#allocation5 + $0x78] sm:$0xff]  ;;  %v90_v1 = vld [vmem:[#allocation5 + $0x70] sm:$0xff]  ;;  %s315_s24 = sshll.u32 %s598_s7, 4  ;;  %s316_s24 = int_to_ptr.hbm [resolvable:$true] %s315_s24 }
   0xf   :  { %96 = vmatpush.msra.mxu0 %v91_v0  ;;  %331 = vmatpush.msra.mxu2 %v91_v0  ;;  %v89_v2 = vld [vmem:[#allocation5 + $0x68] sm:$0xff]  ;;  %v88_v3 = vld [vmem:[#allocation5 + $0x60] sm:$0xff]  ;;  %v87_v4 = vld [vmem:[#allocation5 + $0x58] sm:$0xff] }
  0x10   :  { %v86_v5 = vld [vmem:[#allocation5 + $0x50] sm:$0xff]  ;;  %v85_v6 = vld [vmem:[#allocation5 + $0x48] sm:$0xff]  ;;  %v84_v7 = vld [vmem:[#allocation5 + $0x40] sm:$0xff] }
  0x11   :  { %97 = vmatpush.msra.mxu0 %v90_v1  ;;  %332 = vmatpush.msra.mxu2 %v90_v1  ;;  %v83_v8 = vld [vmem:[#allocation5 + $0x38] sm:$0xff]  ;;  %v82_v9 = vld [vmem:[#allocation5 + $0x30] sm:$0xff]  ;;  %v81_v10 = vld [vmem:[#allocation5 + $0x28] sm:$0xff] }
  0x12   :  { %v80_v11 = vld [vmem:[#allocation5 + $0x20] sm:$0xff]  ;;  %v79_v12 = vld [vmem:[#allocation5 + $0x18] sm:$0xff]  ;;  %v78_v13 = vld [vmem:[#allocation5 + $0x10] sm:$0xff] }
  0x13   :  { %98 = vmatpush.msra.mxu0 %v89_v2  ;;  %333 = vmatpush.msra.mxu2 %v89_v2  ;;  %v77_v14 = vld [vmem:[#allocation5 + $0x8] sm:$0xff]  ;;  %v76_v15 = vld [vmem:[#allocation5] sm:$0xff]  ;;  %v74_v16 = vld [vmem:[#allocation2] sm:$0xff] }
  0x14   :  { %v75_v17 = vld [vmem:[#allocation2 + $0x8] sm:$0xff]  ;;  %v369_v18 = vld [vmem:[%s593_s2] ss:$0 sm:$0xff] }
  0x15   :  { %99 = vmatpush.msra.mxu0 %v88_v3  ;;  %334 = vmatpush.msra.mxu2 %v88_v3 }
  0x17   :  { %100 = vmatpush.msra.mxu0 %v87_v4  ;;  %335 = vmatpush.msra.mxu2 %v87_v4 }
  0x19   :  { %101 = vmatpush.msra.mxu0 %v86_v5  ;;  %336 = vmatpush.msra.mxu2 %v86_v5 }
  0x1b   :  { %102 = vmatpush.msra.mxu0 %v85_v6  ;;  %337 = vmatpush.msra.mxu2 %v85_v6 }
  0x1d   :  { %103 = vmatpush.msra.mxu0 %v84_v7  ;;  %338 = vmatpush.msra.mxu2 %v84_v7 }
  0x1f   :  { %104 = vmatpush.msra.mxu0 %v83_v8  ;;  %339 = vmatpush.msra.mxu2 %v83_v8 }
  0x21   :  { %105 = vmatpush.msra.mxu0 %v82_v9  ;;  %340 = vmatpush.msra.mxu2 %v82_v9 }
  0x23   :  { %106 = vmatpush.msra.mxu0 %v81_v10  ;;  %341 = vmatpush.msra.mxu2 %v81_v10 }
  0x25   :  { %107 = vmatpush.msra.mxu0 %v80_v11  ;;  %342 = vmatpush.msra.mxu2 %v80_v11 }
  0x27   :  { %108 = vmatpush.msra.mxu0 %v79_v12  ;;  %343 = vmatpush.msra.mxu2 %v79_v12 }
  0x29   :  { %109 = vmatpush.msra.mxu0 %v78_v13  ;;  %344 = vmatpush.msra.mxu2 %v78_v13 }
  0x2b   :  { %110 = vmatpush.msra.mxu0 %v77_v14  ;;  %345 = vmatpush.msra.mxu2 %v77_v14 }
  0x2d   :  { %111 = vmatpush.msra.mxu0 %v76_v15  ;;  %346 = vmatpush.msra.mxu2 %v76_v15 }
  0x2e   :  { %112 = vmatmul.f32.vlgmr.msra.gmra.mxu0 %v74_v16  ;;  %115 = vmatmul.f32.vlgmr.msra.gmra.mxu2 %v75_v17 }
  0xab   :  { %v113_v19 = vpop.f32.mrf.mxu0 }
  0xac   :  { %v550_v20 = vadd.f32 %v369_v18, %v113_v19 }
  0xae   :  { %v553_v21 = vmul.f32 0.70710677, %v550_v20 }
  0xb0   :  { %v123_v22 = vmul.f32 %v553_v21, %v553_v21 }
  0xb1   :  { %v116_v23 = vpop.f32.mrf.mxu2 }
  0xb2   :  { %v124_v24 = vmin.f32 %v123_v22, 16.0  ;;  %v557_v25 = vadd.f32 %v369_v18, %v116_v23 }
  0xb4   :  { %v560_v26 = vmul.f32 0.70710677, %v557_v25  ;;  %v136_v27 = vmul.f32 3.8918573e-05, %v124_v24  ;;  %v125_v29 = vmul.f32 2.1237322e-06, %v124_v24 }
  0xb6   :  { %v163_v28 = vmul.f32 %v560_v26, %v560_v26  ;;  %v137_v30 = vadd.f32 0.001143296, %v136_v27  ;;  %v126_v35 = vadd.f32 0.00028619796, %v125_v29 }
  0xb8   :  { %v164_v31 = vmin.f32 %v163_v28, 16.0  ;;  %v138_v32 = vmul.f32 %v137_v30, %v124_v24  ;;  %v127_v42 = vmul.f32 %v126_v35, %v124_v24 }
  0xba   :  { %v165_v33 = vmul.f32 2.1237322e-06, %v164_v31  ;;  %v176_v34 = vmul.f32 3.8918573e-05, %v164_v31  ;;  %v139_v36 = vadd.f32 0.014752088, %v138_v32 }
  0xbb   :  { %v128_v48 = vadd.f32 0.0036580483, %v127_v42 }
  0xbc   :  { %v166_v37 = vadd.f32 0.00028619796, %v165_v33  ;;  %v177_v38 = vadd.f32 0.001143296, %v176_v34  ;;  %v140_v39 = vmul.f32 %v139_v36, %v124_v24  ;;  %v120_v34 = vmul.f32 0.5, %v557_v25 }
  0xbd   :  { %v129_v54 = vmul.f32 %v128_v48, %v124_v24 }
  0xbe   :  { %v167_v40 = vmul.f32 %v166_v37, %v164_v31  ;;  %v178_v41 = vmul.f32 %v177_v38, %v164_v31  ;;  %v141_v43 = vadd.f32 0.112945676, %v140_v39  ;;  %v119_v39 = vmul.f32 0.5, %v550_v20 }
  0xbf   :  { %v130_v59 = vadd.f32 0.05243302, %v129_v54  ;;  %v274_v54 = vld [vmem:[#allocation7 + $0x50] sm:$0xff] }
  0xc0   :  { %v179_v44 = vadd.f32 0.014752088, %v178_v41  ;;  %v168_v45 = vadd.f32 0.0036580483, %v167_v40  ;;  %v142_v46 = vmul.f32 %v141_v43, %v124_v24  ;;  %v279_v40 = vld [vmem:[#allocation7 + $0x78] sm:$0xff]  ;;  %v278_v41 = vld [vmem:[#allocation7 + $0x70] sm:$0xff] }
  0xc1   :  { %v131_v63 = vmul.f32 %v130_v59, %v124_v24  ;;  %347 = vmatpush.msra.mxu3 %v279_v40  ;;  %284 = vmatpush.msra.mxu1 %v279_v40  ;;  %v269_v59 = vld [vmem:[#allocation7 + $0x28] sm:$0xff] }
  0xc2   :  { %v180_v47 = vmul.f32 %v179_v44, %v164_v31  ;;  %v143_v49 = vadd.f32 0.4994258, %v142_v46  ;;  %v169_v51 = vmul.f32 %v168_v45, %v164_v31 }
  0xc3   :  { %v132_v3 = vadd.f32 0.18741608, %v131_v63  ;;  %348 = vmatpush.msra.mxu3 %v278_v41  ;;  %285 = vmatpush.msra.mxu1 %v278_v41  ;;  %v265_v63 = vld [vmem:[#allocation7 + $0x8] sm:$0xff] }
  0xc4   :  { %v181_v50 = vadd.f32 0.112945676, %v180_v47  ;;  %v144_v52 = vmul.f32 %v143_v49, %v124_v24  ;;  %v170_v57 = vadd.f32 0.05243302, %v169_v51  ;;  %v277_v51 = vld [vmem:[#allocation7 + $0x68] sm:$0xff] }
  0xc5   :  { %v133_v8 = vmul.f32 %v132_v3, %v124_v24  ;;  %349 = vmatpush.msra.mxu3 %v277_v51  ;;  %286 = vmatpush.msra.mxu1 %v277_v51 }
  0xc6   :  { %v182_v53 = vmul.f32 %v181_v50, %v164_v31  ;;  %v145_v55 = vadd.f32 1.0, %v144_v52  ;;  %v171_v61 = vmul.f32 %v170_v57, %v164_v31  ;;  %v276_v52 = vld [vmem:[#allocation7 + $0x60] sm:$0xff]  ;;  %v271_v57 = vld [vmem:[#allocation7 + $0x38] sm:$0xff] }
  0xc7   :  { %v134_v17 = vadd.f32 1.1283791, %v133_v8  ;;  %350 = vmatpush.msra.mxu3 %v276_v52  ;;  %287 = vmatpush.msra.mxu1 %v276_v52 }
  0xc8   :  { %v183_v56 = vadd.f32 0.4994258, %v182_v53  ;;  %373 = vrcp.f32 %v145_v55  ;;  %v172_v1 = vadd.f32 0.18741608, %v171_v61  ;;  %vm151_vm1 = vweird.f32 %v145_v55  ;;  %v275_v53 = vld [vmem:[#allocation7 + $0x58] sm:$0xff] }
  0xc9   :  { %v155_v12 = vand.u32 2147483647, %v145_v55  ;;  %v157_v13 = vand.u32 2147483648, %v145_v55  ;;  %v135_v30 = vmul.f32 %v134_v17, %v553_v21  ;;  %v215_v21 = vlaneseq  ;;  %351 = vmatpush.msra.mxu3 %v275_v53  ;;  %288 = vmatpush.msra.mxu1 %v275_v53  ;;  %v267_v61 = vld [vmem:[#allocation7 + $0x18] sm:$0xff] }
  0xca   :  { %v184_v58 = vmul.f32 %v183_v56, %v164_v31  ;;  %v173_v6 = vmul.f32 %v172_v1, %v164_v31  ;;  %v272_v56 = vld [vmem:[#allocation7 + $0x40] sm:$0xff] }
  0xcb   :  { %v158_v23 = vor.u32 1.1754944e-38, %v157_v13  ;;  %vm156_vm7 = vcmp.eq.f32.partialorder %v155_v12, 8.507059e+37  ;;  %v216_v42 = vand.u32 127, %v215_v21  ;;  %352 = vmatpush.msra.mxu3 %v274_v54  ;;  %289 = vmatpush.msra.mxu1 %v274_v54 }
  0xcc   :  { %v185_v60 = vadd.f32 1.0, %v184_v58  ;;  %v174_v14 = vadd.f32 1.1283791, %v173_v6  ;;  %v270_v58 = vld [vmem:[#allocation7 + $0x30] sm:$0xff] }
  0xcd   :  { %vm217_vm8 = vcmp.lt.s32.totalorder %v216_v42, 32 }
  0xce   :  { %375 = vrcp.f32 %v185_v60  ;;  %v374_v62 = vpop.eup %373  ;;  %v197_v11 = vand.u32 2147483648, %v185_v60  ;;  %v195_v16 = vand.u32 2147483647, %v185_v60  ;;  %vm191_vm4 = vweird.f32 %v185_v60 }
  0xcf   :  { %v147_v0 = vmul.f32 %v374_v62, %v145_v55  ;;  %vm152_vm0 = vweird.f32 %v374_v62  ;;  %v175_v24 = vmul.f32 %v174_v14, %v560_v26  ;;  %v273_v55 = vld [vmem:[#allocation7 + $0x48] sm:$0xff] }
  0xd0   :  { %vm153_vm3 = vmor %vm151_vm1, %vm152_vm0  ;;  %v198_v22 = vor.u32 1.1754944e-38, %v197_v11  ;;  %vm196_vm6 = vcmp.eq.f32.partialorder %v195_v16, 8.507059e+37  ;;  %353 = vmatpush.msra.mxu3 %v273_v55  ;;  %290 = vmatpush.msra.mxu1 %v273_v55 }
  0xd1   :  { %v148_v2 = vsub.f32 1.0, %v147_v0  ;;  %v264_v0 = vld [vmem:[#allocation7] sm:$0xff] }
  0xd2   :  { %354 = vmatpush.msra.mxu3 %v272_v56  ;;  %291 = vmatpush.msra.mxu1 %v272_v56 }
  0xd3   :  { %v149_v5 = vmul.f32 %v374_v62, %v148_v2 }
  0xd4   :  { %v376_v4 = vpop.eup %375  ;;  %355 = vmatpush.msra.mxu3 %v271_v57  ;;  %292 = vmatpush.msra.mxu1 %v271_v57 }
  0xd5   :  { %v187_v7 = vmul.f32 %v376_v4, %v185_v60  ;;  %v150_v10 = vadd.f32 %v374_v62, %v149_v5  ;;  %vm192_vm2 = vweird.f32 %v376_v4  ;;  %v268_v60 = vld [vmem:[#allocation7 + $0x20] sm:$0xff] }
  0xd6   :  { %vm193_vm5 = vmor %vm191_vm4, %vm192_vm2  ;;  %356 = vmatpush.msra.mxu3 %v270_v58  ;;  %293 = vmatpush.msra.mxu1 %v270_v58 }
  0xd7   :  { %v188_v9 = vsub.f32 1.0, %v187_v7  ;;  %v154_v19 = vsel %vm153_vm3, %v374_v62, %v150_v10  ;;  %v266_v62 = vld [vmem:[#allocation7 + $0x10] sm:$0xff] }
  0xd8   :  { %v159_v29 = vsel %vm156_vm7, %v158_v23, %v154_v19  ;;  %357 = vmatpush.msra.mxu3 %v269_v59  ;;  %294 = vmatpush.msra.mxu1 %v269_v59  ;;  %v371_v19 = vld [vmem:[%s595_s4] ss:$0 sm:$0xff]  ;;  %s488_s4 = smov [#allocation8]  }
  0xd9   :  { %v189_v15 = vmul.f32 %v376_v4, %v188_v9  ;;  %v160_v33 = vmul.f32 %v159_v29, %v135_v30  ;;  %s313_s21 = sshll.u32 %s488_s4, 4  ;;  %s314_s21 = int_to_ptr.vmem [resolvable:$true] %s313_s21 }
  0xda   :  { %358 = vmatpush.msra.mxu3 %v268_v60  ;;  %295 = vmatpush.msra.mxu1 %v268_v60 }
  0xdb   :  { %v190_v18 = vadd.f32 %v376_v4, %v189_v15  ;;  %v329_v37 = vclamps-f32 %v160_v33, 1.0  ;;  %v370_v15 = vld [vmem:[%s594_s3] ss:$0 sm:$0xff] }
  0xdc   :  { %359 = vmatpush.msra.mxu3 %v267_v61  ;;  %296 = vmatpush.msra.mxu1 %v267_v61  ;;  %v372_v33 = vld [vmem:[%s597_s6] ss:$0 sm:$0xff] }
  0xdd   :  { %v194_v27 = vsel %vm193_vm5, %v376_v4, %v190_v18  ;;  %v203_v38 = vadd.f32 1.0, %v329_v37 }
  0xde   :  { %v199_v28 = vsel %vm196_vm6, %v198_v22, %v194_v27  ;;  %360 = vmatpush.msra.mxu3 %v266_v62  ;;  %297 = vmatpush.msra.mxu1 %v266_v62 }
  0xdf   :  { %v200_v31 = vmul.f32 %v199_v28, %v175_v24  ;;  %v205_v26 = vmul.f32 %v203_v38, %v119_v39 }
  0xe0   :  { %361 = vmatpush.msra.mxu3 %v265_v63  ;;  %298 = vmatpush.msra.mxu1 %v265_v63 }
  0xe1   :  { %v330_v32 = vclamps-f32 %v200_v31, 1.0 }
  0xe2   :  { %362 = vmatpush.msra.mxu3 %v264_v0  ;;  %299 = vmatpush.msra.mxu1 %v264_v0 }
  0xe3   :  { %v204_v35 = vadd.f32 1.0, %v330_v32 }
  0xe5   :  { %v206_v36 = vmul.f32 %v204_v35, %v120_v34 }
  0xe7   :  { %209 = vadd.xlane.f32.xlu0 %v206_v36 }
  0xef   :  { %207 = vadd.xlane.f32.xlu0 %v205_v26 }
 0x15a   :  { %v210_v43 = vpop.xlane.xlu0 %209 }
 0x15b   :  { %v212_v44 = vmul.f32 0.03125, %v210_v43 }
 0x15d   :  { %v568_v25 = vsub.f32 %v206_v36, %v212_v44 }
 0x15f   :  { %v219_v45 = vsel %vm217_vm8, %v568_v25, 0.0 }
 0x160   :  { %v221_v46 = vmul.f32 %v219_v45, %v219_v45 }
 0x162   :  { %224 = vadd.xlane.f32.xlu1 %v221_v46  ;;  %v208_v20 = vpop.xlane.xlu0 %207 }
 0x163   :  { %v211_v47 = vmul.f32 0.03125, %v208_v20 }
 0x165   :  { %v571_v48 = vsub.f32 %v205_v26, %v211_v47 }
 0x167   :  { %v218_v49 = vsel %vm217_vm8, %v571_v48, 0.0 }
 0x168   :  { %v220_v50 = vmul.f32 %v218_v49, %v218_v49 }
 0x16a   :  { %222 = vadd.xlane.f32.xlu1 %v220_v50 }
 0x1d5   :  { %v225_v1 = vpop.xlane.xlu1 %224 }
 0x1d6   :  { %v227_v2 = vmul.f32 0.03125, %v225_v1 }
 0x1d8   :  { %v229_v3 = vadd.f32 1e-12, %v227_v2 }
 0x1da   :  { %377 = vrsqrt.f32 %v229_v3  ;;  %vm246_vm10 = vweird.f32 %v229_v3 }
 0x1dd   :  { %v223_v4 = vpop.xlane.xlu1 %222 }
 0x1de   :  { %v226_v5 = vmul.f32 0.03125, %v223_v4 }
 0x1e0   :  { %v378_v6 = vpop.eup %377  ;;  %v228_v7 = vadd.f32 1e-12, %v226_v5 }
 0x1e1   :  { %v241_v8 = vmul.f32 %v378_v6, %v229_v3  ;;  %vm247_vm9 = vweird.f32 %v378_v6 }
 0x1e2   :  { %379 = vrsqrt.f32 %v228_v7  ;;  %vm248_vm11 = vmor %vm246_vm10, %vm247_vm9  ;;  %vm236_vm13 = vweird.f32 %v228_v7 }
 0x1e3   :  { %v242_v9 = vmul.f32 %v378_v6, %v241_v8 }
 0x1e5   :  { %v243_v10 = vmul.f32 0.5, %v242_v9 }
 0x1e7   :  { %v244_v11 = vsub.f32 1.5, %v243_v10 }
 0x1e8   :  { %v380_v12 = vpop.eup %379 }
 0x1e9   :  { %v245_v13 = vmul.f32 %v378_v6, %v244_v11  ;;  %v231_v14 = vmul.f32 %v380_v12, %v228_v7  ;;  %vm237_vm12 = vweird.f32 %v380_v12 }
 0x1ea   :  { %vm238_vm14 = vmor %vm236_vm13, %vm237_vm12 }
 0x1eb   :  { %v232_v16 = vmul.f32 %v380_v12, %v231_v14  ;;  %v249_v17 = vsel %vm248_vm11, %v378_v6, %v245_v13 }
 0x1ec   :  { %v251_v18 = vmul.f32 %v249_v17, %v568_v25 }
 0x1ed   :  { %v233_v22 = vmul.f32 0.5, %v232_v16 }
 0x1ee   :  { %v257_v23 = vmul.f32 %v370_v15, %v251_v18 }
 0x1ef   :  { %v234_v24 = vsub.f32 1.5, %v233_v22 }
 0x1f0   :  { %v263_v27 = vadd.f32 %v371_v19, %v257_v23 }
 0x1f1   :  { %v235_v28 = vmul.f32 %v380_v12, %v234_v24 }
 0x1f2   :  { %303 = vmatmul.f32.vlgmr.msra.gmra.mxu3 %v263_v27 }
 0x1f3   :  { %v239_v29 = vsel %vm238_vm14, %v380_v12, %v235_v28 }
 0x1f4   :  { %v250_v30 = vmul.f32 %v239_v29, %v571_v48 }
 0x1f6   :  { %v256_v31 = vmul.f32 %v370_v15, %v250_v30 }
 0x1f8   :  { %v262_v32 = vadd.f32 %v371_v19, %v256_v31 }
 0x1fa   :  { %300 = vmatmul.f32.vlgmr.msra.gmra.mxu1 %v262_v32 }
 0x275   :  { %v304_v34 = vpop.f32.mrf.mxu3 }
 0x276   :  { %v305_v35 = vadd.f32 %v372_v33, %v304_v34 }
 0x277   :  { %v301_v36 = vpop.f32.mrf.mxu1 }
 0x278   :  { %308 = vst [vmem:[#allocation8 + $0x8] sm:$0xff] %v305_v35  ;;  %v302_v37 = vadd.f32 %v372_v33, %v301_v36 }
 0x27a   :  { %307 = vst [vmem:[#allocation8] sm:$0xff] %v302_v37 }
 0x27b   :  { %321 = dma.vmem_to_hbm [thread:$0]  %s314_s21, 256, %s316_s24, [#allocation4], %s484_s9, %s484_s9, %s485_s10  }
 0x27c   :  { %481 = dma.done.wait [#allocation4], 256  }
 0x27d   :  { %482 = vsyncadd [#allocation4], 4294967040 }
 0x27e   :  { %326 = vsyncpa [#allocation3], 1 }
 0x27f   :  { %327 = vsyncpa [#allocation6], 1 }
 0x280   :  { %328 = vsyncpa [#allocation4], 1 }

</bundles_post_ra>
